<compile_context>
chip_gen: v5e
topology: v5e:2x2
jax: 0.10.0
libtpu: 0.0.40
codegen_flags: <defaults>
</compile_context>

<pallas_src>
import jax
import jax.numpy as jnp
from jax.experimental import pallas as pl
from jax.experimental.pallas import tpu as pltpu


def _round_up(v, m):
    return (v + m - 1) // m * m


def _mlp_kernel(x_ref, w_ref, b_ref, meaning_ref, lang_ref):
    # One fused MXU matmul for both projections:
    #   [tm, E] @ [E, 2*e_pad] -> [tm, 2*e_pad], accumulated in f32.
    acc = jnp.dot(x_ref[...], w_ref[...], preferred_element_type=jnp.float32)
    acc = acc + b_ref[...]                       # f32 bias, broadcasts over rows
    e_pad = meaning_ref.shape[-1]                # static; multiple of 128 -> aligned split
    meaning_ref[...] = acc[:, :e_pad].astype(meaning_ref.dtype)
    lang_ref[...] = acc[:, e_pad:].astype(lang_ref.dtype)


def prepare_mlp_params(w_meaning, b_meaning, w_lang, b_lang,
                       *, compute_dtype=jnp.bfloat16):
    """One-time parameter prep (NOT on the per-call hot path).

    w_*: [in_features, out_features] (PyTorch nn.Linear weight, transposed).
    Returns (fused_w [E, 2*e_pad] in compute_dtype, fused_b [1, 2*e_pad] f32).
    Each head's columns are padded to e_pad = round_up(E, 128) so per-head
    output stores are full-vreg and the in-kernel split is tile-aligned.
    """
    E = w_meaning.shape[0]
    e_pad = _round_up(E, 128)

    def pad_w(w):
        return jnp.pad(w, ((0, 0), (0, e_pad - E))) if e_pad != E else w

    def pad_b(b):
        return jnp.pad(b, (0, e_pad - E)) if e_pad != E else b

    fused_w = jnp.concatenate([pad_w(w_meaning), pad_w(w_lang)], axis=1)
    fused_w = fused_w.astype(compute_dtype)                      # [E, 2*e_pad]
    fused_b = jnp.concatenate([pad_b(b_meaning), pad_b(b_lang)], axis=0)
    fused_b = fused_b[None, :].astype(jnp.float32)                # [1, 2*e_pad]
    return fused_w, fused_b


def mlp_forward(x, fused_w, fused_b, *, tm=None, out_dtype=None):
    """x: [B, E]. fused_w/fused_b from prepare_mlp_params. Returns (meaning, lang)."""
    B, E = x.shape
    n_pad = fused_w.shape[1]
    e_pad = n_pad // 2
    out_dtype = out_dtype or x.dtype

    # Cast activations to the MXU compute dtype (bf16 by default).
    xq = x.astype(fused_w.dtype)

    # --- Batch tile: multiple of 8 sublanes; grow to 512 rows when possible ---
    if tm is None:
        if B >= 512:
            tm = 512
        elif B >= 256:
            tm = 256
        elif B >= 128:
            tm = 128
        else:
            tm = _round_up(B, 8)
    b_pad = _round_up(B, tm)
    if b_pad != B:
        xq = jnp.pad(xq, ((0, b_pad - B), (0, 0)))

    grid = (b_pad // tm,)

    # --- VMEM budget: resident weight (1 buf) + bias + pipelined x / outputs ---
    w_bytes = fused_w.size * fused_w.dtype.itemsize                   # Buffered(1)
    bias_bytes = fused_b.size * fused_b.dtype.itemsize                # Buffered(1)
    x_bytes = 2 * tm * E * jnp.dtype(fused_w.dtype).itemsize          # double-buffered
    out_bytes = 2 * 2 * tm * e_pad * jnp.dtype(out_dtype).itemsize    # 2 heads, dbl-buf
    acc_bytes = tm * n_pad * 4                                        # f32 accumulator
    needed = w_bytes + bias_bytes + x_bytes + out_bytes + acc_bytes
    vmem_limit = max(32 << 20, min(int(needed * 1.25) + (4 << 20), 100 << 20))

    cost = pl.CostEstimate(
        flops=2 * b_pad * E * n_pad,
        transcendentals=0,
        bytes_accessed=(xq.size * xq.dtype.itemsize
                        + fused_w.size * fused_w.dtype.itemsize
                        + fused_b.size * fused_b.dtype.itemsize
                        + 2 * b_pad * e_pad * jnp.dtype(out_dtype).itemsize),
    )

    meaning, lang = pl.pallas_call(
        _mlp_kernel,
        out_shape=(
            jax.ShapeDtypeStruct((b_pad, e_pad), out_dtype),
            jax.ShapeDtypeStruct((b_pad, e_pad), out_dtype),
        ),
        grid_spec=pltpu.PrefetchScalarGridSpec(
            num_scalar_prefetch=0,
            grid=grid,
            in_specs=[
                # x tile: streamed / double-buffered over the batch grid.
                pl.BlockSpec((tm, E), lambda i: (i, 0)),
                # Fused weight + bias: constant index -> VMEM-resident, single buffer.
                pl.BlockSpec((E, n_pad), lambda i: (0, 0),
                             pipeline_mode=pl.Buffered(1)),
                pl.BlockSpec((1, n_pad), lambda i: (0, 0),
                             pipeline_mode=pl.Buffered(1)),
            ],
            out_specs=[
                pl.BlockSpec((tm, e_pad), lambda i: (i, 0)),
                pl.BlockSpec((tm, e_pad), lambda i: (i, 0)),
            ],
        ),
        compiler_params=pltpu.CompilerParams(
            dimension_semantics=("parallel",),    # megacore sharding on v7x
            vmem_limit_bytes=vmem_limit,
        ),
        cost_estimate=cost,
    )(xq, fused_w, fused_b)

    # Drop padding only when it exists (aligned shapes take the zero-copy path).
    if b_pad != B:
        meaning, lang = meaning[:B], lang[:B]
    if e_pad != E:
        meaning, lang = meaning[:, :E], lang[:, :E]
    return meaning, lang


if __name__ == "__main__":
    key = jax.random.PRNGKey(0)

    def run_case(batch, emb_size, kseed):
        kx, kwm, kbm, kwl, kbl = jax.random.split(kseed, 5)
        x = jax.random.normal(kx, (batch, emb_size), dtype=jnp.float32)
        # PyTorch stores Linear weight as [out, in]; the kernel uses [in, out].
        w_meaning = jax.random.normal(kwm, (emb_size, emb_size), jnp.float32) * 0.02
        b_meaning = jax.random.normal(kbm, (emb_size,), jnp.float32) * 0.02
        w_lang = jax.random.normal(kwl, (emb_size, emb_size), jnp.float32) * 0.02
        b_lang = jax.random.normal(kbl, (emb_size,), jnp.float32) * 0.02

        # One-time prep (hoisted out of the per-call forward path).
        fused_w, fused_b = prepare_mlp_params(w_meaning, b_meaning, w_lang, b_lang)

        meaning, lang = mlp_forward(x, fused_w, fused_b)
        jax.block_until_ready((meaning, lang))

        # Reference with the same bf16 input quantization, f32 accumulation.
        xq = x.astype(jnp.bfloat16).astype(jnp.float32)
        wmq = w_meaning.astype(jnp.bfloat16).astype(jnp.float32)
        wlq = w_lang.astype(jnp.bfloat16).astype(jnp.float32)
        ref_meaning = xq @ wmq + b_meaning
        ref_lang = xq @ wlq + b_lang

        assert meaning.shape == (batch, emb_size) and lang.shape == (batch, emb_size)
        assert jnp.allclose(meaning, ref_meaning, atol=1e-2, rtol=1e-2)
        assert jnp.allclose(lang, ref_lang, atol=1e-2, rtol=1e-2)

    k1, k2 = jax.random.split(key)
    run_case(16, 128, k1)   # lane/sublane-aligned path (no padding, no slices)
    run_case(8, 32, k2)     # tiny unaligned path (exercises pad + slice-off)

    print("KERNEL_OK")
</pallas_src>

<mosaic_0001>
module attributes {stable_mosaic.version = 11 : i64} {
  func.func @_mlp_kernel(%arg0: i32, %arg1: memref<16x128xbf16, #tpu.memory_space<vmem>>, %arg2: memref<128x256xbf16, #tpu.memory_space<vmem>>, %arg3: memref<1x256xf32, #tpu.memory_space<vmem>>, %arg4: memref<16x128xf32, #tpu.memory_space<vmem>>, %arg5: memref<16x128xf32, #tpu.memory_space<vmem>>) attributes {dimension_semantics = [#tpu.dimension_semantics<parallel>], iteration_bounds = array<i64: 1>, scalar_prefetch = 0 : i64, scratch_operands = 0 : i64, tpu.core_type = #tpu.core_type<tc>, window_params = [{transform_indices = @transform_0, window_bounds = array<i64: 16, 128>}, {pipeline_mode = #tpu.pipeline_mode<synchronous>, transform_indices = @transform_1, window_bounds = array<i64: 128, 256>}, {pipeline_mode = #tpu.pipeline_mode<synchronous>, transform_indices = @transform_2, window_bounds = array<i64: 1, 256>}, {transform_indices = @transform_3, window_bounds = array<i64: 16, 128>}, {transform_indices = @transform_4, window_bounds = array<i64: 16, 128>}]} {
    %c0 = arith.constant 0 : index
    %c0_0 = arith.constant 0 : index
    %0 = vector.load %arg1[%c0, %c0_0] : memref<16x128xbf16, #tpu.memory_space<vmem>>, vector<16x128xbf16>
    %c0_1 = arith.constant 0 : index
    %c0_2 = arith.constant 0 : index
    %1 = vector.load %arg2[%c0_1, %c0_2] : memref<128x256xbf16, #tpu.memory_space<vmem>>, vector<128x256xbf16>
    %cst = arith.constant dense<0.000000e+00> : vector<16x256xf32>
    %2 = tpu.matmul %0, %1, %cst {dimension_numbers = #tpu.dot_dimension_numbers<[1], [0], [0], [1], [0, 0, 1, 1], [], []>} : vector<16x128xbf16>, vector<128x256xbf16>, vector<16x256xf32> -> vector<16x256xf32>
    %c0_3 = arith.constant 0 : index
    %c0_4 = arith.constant 0 : index
    %3 = vector.load %arg3[%c0_3, %c0_4] : memref<1x256xf32, #tpu.memory_space<vmem>>, vector<1x256xf32>
    %4 = vector.broadcast %3 : vector<1x256xf32> to vector<16x256xf32>
    %5 = arith.addf %2, %4 : vector<16x256xf32>
    %6 = vector.extract_strided_slice %5 {offsets = [0, 0], sizes = [16, 128], strides = [1, 1]} : vector<16x256xf32> to vector<16x128xf32>
    %c0_5 = arith.constant 0 : index
    %c0_6 = arith.constant 0 : index
    %7 = vector.load %arg4[%c0_5, %c0_6] : memref<16x128xf32, #tpu.memory_space<vmem>>, vector<16x128xf32>
    tpu.vector_store %arg4[%c0_5, %c0_6], %6 {strides = array<i32>} : memref<16x128xf32, #tpu.memory_space<vmem>>, vector<16x128xf32>,
    %8 = vector.extract_strided_slice %5 {offsets = [0, 128], sizes = [16, 128], strides = [1, 1]} : vector<16x256xf32> to vector<16x128xf32>
    %c0_7 = arith.constant 0 : index
    %c0_8 = arith.constant 0 : index
    %9 = vector.load %arg5[%c0_7, %c0_8] : memref<16x128xf32, #tpu.memory_space<vmem>>, vector<16x128xf32>
    tpu.vector_store %arg5[%c0_7, %c0_8], %8 {strides = array<i32>} : memref<16x128xf32, #tpu.memory_space<vmem>>, vector<16x128xf32>,
    return
  }
  func.func @transform_0(%arg0: i32) -> (i32, i32) {
    %c0_i32 = arith.constant 0 : i32
    %c0_i32_0 = arith.constant 0 : i32
    return %arg0, %c0_i32 : i32, i32
  }
  func.func @transform_1(%arg0: i32) -> (i32, i32) {
    %c0_i32 = arith.constant 0 : i32
    %c0_i32_0 = arith.constant 0 : i32
    %c0_i32_1 = arith.constant 0 : i32
    return %c0_i32, %c0_i32_0 : i32, i32
  }
  func.func @transform_2(%arg0: i32) -> (i32, i32) {
    %c0_i32 = arith.constant 0 : i32
    %c0_i32_0 = arith.constant 0 : i32
    %c0_i32_1 = arith.constant 0 : i32
    return %c0_i32, %c0_i32_0 : i32, i32
  }
  func.func @transform_3(%arg0: i32) -> (i32, i32) {
    %c0_i32 = arith.constant 0 : i32
    %c0_i32_0 = arith.constant 0 : i32
    return %arg0, %c0_i32 : i32, i32
  }
  func.func @transform_4(%arg0: i32) -> (i32, i32) {
    %c0_i32 = arith.constant 0 : i32
    %c0_i32_0 = arith.constant 0 : i32
    return %arg0, %c0_i32 : i32, i32
  }
}

</mosaic_0001>

<bundles_post_ra>
// kernel: tpu_custom_call.1
= control target key start
LH: loop header
LB: loop body
LE: loop exit
PB: predicated region body
PF: predicated region fallthrough
CT: control target
= control target key end

     0   :  { %10 = vsyncpa [#allocation3], 0  ;;  %s523_s0 = inlined_call_operand.hbm [shape: bf16[16,128], index: 0, kind: input, shape index: {}]   ;;  %s524_s1 = inlined_call_operand.hbm [shape: bf16[128,256], index: 1, kind: input, shape index: {}]   ;;  %s525_s2 = inlined_call_operand.hbm [shape: f32[1,256], index: 2, kind: input, shape index: {}]   ;;  %s526_s3 = inlined_call_operand.hbm [shape: f32[16,128], index: 3, kind: output, shape index: {0}]   ;;  %s527_s4 = inlined_call_operand.hbm [shape: f32[16,128], index: 4, kind: output, shape index: {1}]  }
   0x1   :  { %11 = vsyncpa [#allocation6], 0 }
   0x2   :  { %12 = vsyncpa [#allocation4], 0  ;;  %s31_s17 = sshll.u32 %s524_s1, 4  ;;  %s32_s17 = int_to_ptr.hbm [resolvable:$true] %s31_s17 }
   0x3   :  { %13 = vsyncpa [#allocation10], 0  ;;  %s465_s18 = smov [#allocation5]   ;;  %s18_s22 = sshll.u32 %s523_s0, 4  ;;  %s19_s22 = int_to_ptr.hbm [resolvable:$true] %s18_s22 }
   0x4   :  { %s33_s19 = sshll.u32 %s465_s18, 4  ;;  %s466_s23 = smov 128   ;;  %s34_s19 = int_to_ptr.vmem [resolvable:$true] %s33_s19 }
   0x5   :  { %s467_s24 = smov 8   ;;  %s468_s25 = smov [#allocation2]  }
   0x6   :  { %39 = dma.hbm_to_vmem [thread:$0]  %s32_s17, 2048, %s34_s19, [#allocation6], %s466_s23, %s466_s23, %s467_s24  }
   0x7   :  { %s20_s26 = sshll.u32 %s468_s25, 4  ;;  %s469_s1 = smov 64   ;;  %s21_s26 = int_to_ptr.vmem [resolvable:$true] %s20_s26 }
   0x8   :  { %s470_s27 = smov 4   ;;  %s45_s30 = sshll.u32 %s525_s2, 4  ;;  %s46_s30 = int_to_ptr.hbm [resolvable:$true] %s45_s30 }
   0x9   :  { %26 = dma.hbm_to_vmem [thread:$0]  %s19_s22, 128, %s21_s26, [#allocation3], %s469_s1, %s469_s1, %s470_s27  }
   0xa   :  { %s471_s5 = smov [#allocation7]  }
   0xb   :  { %s47_s0 = sshll.u32 %s471_s5, 4  ;;  %s48_s0 = int_to_ptr.vmem [resolvable:$true] %s47_s0 }
   0xc   :  { %50 = dma.hbm_to_vmem [thread:$0]  %s46_s30, 32, %s48_s0, [#allocation6]  }
   0xd   :  { %457 = dma.done.wait [#allocation3], 128  }
   0xe   :  { %458 = vsyncadd [#allocation3], 4294967168 }
   0xf   :  { %459 = dma.done.wait [#allocation6], 2080  }
  0x10   :  { %460 = vsyncadd [#allocation6], 4294965216  ;;  %v305_v0 = vld [vmem:[#allocation5 + $0x70] sm:$0xf]  ;;  %v327_v1 = vld [vmem:[#allocation5 + $0x74] sm:$0xf0] }
  0x11   :  { %v326_v2 = vld [vmem:[#allocation5 + $0x74] sm:$0xf]  ;;  %v306_v3 = vor.u32 %v327_v1, %v305_v0  ;;  %v307_v4 = vld [vmem:[#allocation5 + $0x78] sm:$0xf0]  ;;  %v297_v5 = vld [vmem:[#allocation5 + $0x60] sm:$0xf] }
  0x12   :  { %v325_v6 = vld [vmem:[#allocation5 + $0x64] sm:$0xf0]  ;;  %v310_v7 = vor.u32 %v326_v2, %v307_v4  ;;  %v324_v8 = vld [vmem:[#allocation5 + $0x64] sm:$0xf]  ;;  %v299_v9 = vld [vmem:[#allocation5 + $0x68] sm:$0xf0] }
  0x13   :  { %173 = vmatpush.bf16.msra.mxu0 %v306_v3  ;;  %v298_v10 = vor.u32 %v325_v6, %v297_v5  ;;  %v302_v11 = vor.u32 %v324_v8, %v299_v9  ;;  %v289_v12 = vld [vmem:[#allocation5 + $0x50] sm:$0xf]  ;;  %v323_v13 = vld [vmem:[#allocation5 + $0x54] sm:$0xf0]  ;;  %v322_v14 = vld [vmem:[#allocation5 + $0x54] sm:$0xf] }
  0x14   :  { %187 = vmatpush.bf16.msra.mxu1 %v310_v7  ;;  %v291_v15 = vld [vmem:[#allocation5 + $0x58] sm:$0xf0]  ;;  %v290_v16 = vor.u32 %v323_v13, %v289_v12  ;;  %v281_v18 = vld [vmem:[#allocation5 + $0x40] sm:$0xf]  ;;  %v321_v19 = vld [vmem:[#allocation5 + $0x44] sm:$0xf0] }
  0x15   :  { %v294_v17 = vor.u32 %v322_v14, %v291_v15  ;;  %v320_v20 = vld [vmem:[#allocation5 + $0x44] sm:$0xf]  ;;  %v283_v21 = vld [vmem:[#allocation5 + $0x48] sm:$0xf0]  ;;  %v282_v22 = vor.u32 %v321_v19, %v281_v18  ;;  %v273_v24 = vld [vmem:[#allocation5 + $0x30] sm:$0xf] }
  0x16   :  { %v286_v23 = vor.u32 %v320_v20, %v283_v21  ;;  %v319_v25 = vld [vmem:[#allocation5 + $0x34] sm:$0xf0]  ;;  %v318_v26 = vld [vmem:[#allocation5 + $0x34] sm:$0xf]  ;;  %v275_v27 = vld [vmem:[#allocation5 + $0x38] sm:$0xf0] }
  0x17   :  { %174 = vmatpush.bf16.msra.mxu0 %v298_v10  ;;  %v274_v28 = vor.u32 %v319_v25, %v273_v24  ;;  %v278_v29 = vor.u32 %v318_v26, %v275_v27  ;;  %v265_v30 = vld [vmem:[#allocation5 + $0x20] sm:$0xf]  ;;  %v317_v31 = vld [vmem:[#allocation5 + $0x24] sm:$0xf0]  ;;  %v316_v32 = vld [vmem:[#allocation5 + $0x24] sm:$0xf] }
  0x18   :  { %188 = vmatpush.bf16.msra.mxu1 %v302_v11  ;;  %v267_v33 = vld [vmem:[#allocation5 + $0x28] sm:$0xf0]  ;;  %v266_v34 = vor.u32 %v317_v31, %v265_v30  ;;  %v257_v36 = vld [vmem:[#allocation5 + $0x10] sm:$0xf]  ;;  %v315_v37 = vld [vmem:[#allocation5 + $0x14] sm:$0xf0] }
  0x19   :  { %v270_v35 = vor.u32 %v316_v32, %v267_v33  ;;  %v314_v38 = vld [vmem:[#allocation5 + $0x14] sm:$0xf]  ;;  %v259_v39 = vld [vmem:[#allocation5 + $0x18] sm:$0xf0]  ;;  %v258_v40 = vor.u32 %v315_v37, %v257_v36  ;;  %v249_v42 = vld [vmem:[#allocation5] sm:$0xf] }
  0x1a   :  { %v262_v41 = vor.u32 %v314_v38, %v259_v39  ;;  %v313_v43 = vld [vmem:[#allocation5 + $0x4] sm:$0xf0]  ;;  %v312_v44 = vld [vmem:[#allocation5 + $0x4] sm:$0xf]  ;;  %v251_v45 = vld [vmem:[#allocation5 + $0x8] sm:$0xf0] }
  0x1b   :  { %175 = vmatpush.bf16.msra.mxu0 %v290_v16  ;;  %v250_v46 = vor.u32 %v313_v43, %v249_v42  ;;  %v254_v47 = vor.u32 %v312_v44, %v251_v45  ;;  %v311_v48 = vld [vmem:[#allocation2] sm:$0xff]  ;;  %v81_v49 = vld [vmem:[#allocation7] sm:$0x3]  ;;  %s472_s2 = smov [#allocation8]   ;;  %s211_s9 = sshll.u32 %s526_s3, 4  ;;  %s212_s9 = int_to_ptr.hbm [resolvable:$true] %s211_s9 }
  0x1c   :  { %189 = vmatpush.bf16.msra.mxu1 %v294_v17  ;;  %v83_v50 = vperm.slane %v81_v49, 0  ;;  %v84_v51 = vperm.slane %v81_v49, 1  ;;  %s209_s6 = sshll.u32 %s472_s2, 4  ;;  %s473_s10 = smov [#allocation9]   ;;  %s210_s6 = int_to_ptr.vmem [resolvable:$true] %s209_s6 }
  0x1d   :  { %s222_s11 = sshll.u32 %s473_s10, 4  ;;  %s224_s14 = sshll.u32 %s527_s4, 4  ;;  %s223_s11 = int_to_ptr.vmem [resolvable:$true] %s222_s11  ;;  %s225_s14 = int_to_ptr.hbm [resolvable:$true] %s224_s14 }
  0x1f   :  { %176 = vmatpush.bf16.msra.mxu0 %v282_v22 }
  0x20   :  { %190 = vmatpush.bf16.msra.mxu1 %v286_v23 }
  0x23   :  { %177 = vmatpush.bf16.msra.mxu0 %v274_v28 }
  0x24   :  { %191 = vmatpush.bf16.msra.mxu1 %v278_v29 }
  0x27   :  { %178 = vmatpush.bf16.msra.mxu0 %v266_v34 }
  0x28   :  { %192 = vmatpush.bf16.msra.mxu1 %v270_v35 }
  0x2b   :  { %179 = vmatpush.bf16.msra.mxu0 %v258_v40 }
  0x2c   :  { %193 = vmatpush.bf16.msra.mxu1 %v262_v41 }
  0x2f   :  { %180 = vmatpush.bf16.msra.mxu0 %v250_v46 }
  0x30   :  { %194 = vmatpush.bf16.msra.mxu1 %v254_v47 }
  0x32   :  { %181 = vmatmul.bf16.vlgmr.msra.gmra.mxu0 %v311_v48 }
  0x33   :  { %195 = vmatmul.bf16.vlgmr.msra.gmra.mxu1 %v311_v48 }
  0xaf   :  { %v182_v52 = vpop.f32.mrf.mxu0 }
  0xb0   :  { %v183_v53 = vadd.f32 %v182_v52, %v83_v50  ;;  %v196_v54 = vpop.f32.mrf.mxu1 }
  0xb1   :  { %v197_v55 = vadd.f32 %v196_v54, %v84_v51 }
  0xb2   :  { %201 = vst [vmem:[#allocation8] sm:$0xff] %v183_v53 }
  0xb3   :  { %203 = vst [vmem:[#allocation9] sm:$0xff] %v197_v55 }
  0xb7   :  { %v184_v56 = vpop.f32.mrf.mxu0 }
  0xb8   :  { %v185_v57 = vadd.f32 %v184_v56, %v83_v50  ;;  %v198_v58 = vpop.f32.mrf.mxu1 }
  0xb9   :  { %v199_v59 = vadd.f32 %v198_v58, %v84_v51 }
  0xba   :  { %202 = vst [vmem:[#allocation8 + $0x8] sm:$0xff] %v185_v57 }
  0xbb   :  { %204 = vst [vmem:[#allocation9 + $0x8] sm:$0xff] %v199_v59  ;;  %217 = dma.vmem_to_hbm [thread:$0]  %s210_s6, 256, %s212_s9, [#allocation4], %s466_s23, %s466_s23, %s467_s24  }
  0xbc   :  { %230 = dma.vmem_to_hbm [thread:$0]  %s223_s11, 256, %s225_s14, [#allocation10], %s466_s23, %s466_s23, %s467_s24  }
  0xbd   :  { %461 = dma.done.wait [#allocation4], 256  }
  0xbe   :  { %462 = vsyncadd [#allocation4], 4294967040 }
  0xbf   :  { %463 = dma.done.wait [#allocation10], 256  }
  0xc0   :  { %464 = vsyncadd [#allocation10], 4294967040 }
  0xc1   :  { %239 = vsyncpa [#allocation3], 1 }
  0xc2   :  { %240 = vsyncpa [#allocation6], 1 }
  0xc3   :  { %241 = vsyncpa [#allocation4], 1 }
  0xc4   :  { %242 = vsyncpa [#allocation10], 1 }

</bundles_post_ra>
